<compile_context>
chip_gen: v5e
topology: v5e:2x2
jax: 0.10.0
libtpu: 0.0.40
codegen_flags: <defaults>
</compile_context>

<pallas_src>
import functools

import numpy as np
import jax
import jax.numpy as jnp
from jax import lax
from jax.experimental import pallas as pl
from jax.experimental.pallas import tpu as pltpu


def _vmem_limit_bytes():
    try:
        cap = pltpu.get_tpu_info().vmem_capacity_bytes
    except Exception:
        return 48 * 1024 * 1024          # safe everywhere (v7x has 64 MiB/TC)
    # ~96 MiB on 128-MiB parts (v5e/v6e), 48 MiB on 64-MiB parts (v7x).
    return min(int(cap * 3 // 4), 112 * 1024 * 1024)


_VMEM_LIMIT = _vmem_limit_bytes()


# --------------------------- tiled linear (matmul) ---------------------------

def _matmul_kernel_acc(x_ref, w_ref, o_ref, acc_ref):
    @pl.when(pl.program_id(2) == 0)
    def _init():
        acc_ref[...] = jnp.zeros_like(acc_ref)

    acc_ref[...] += jnp.dot(x_ref[...], w_ref[...],
                            preferred_element_type=jnp.float32)

    @pl.when(pl.program_id(2) == pl.num_programs(2) - 1)
    def _store():
        o_ref[...] = acc_ref[...].astype(o_ref.dtype)


def _matmul_kernel_noacc(x_ref, w_ref, o_ref):
    # Whole reduction dim fits in one tile: no scratch round-trip, no pl.when.
    o_ref[...] = jnp.dot(x_ref[...], w_ref[...],
                         preferred_element_type=jnp.float32).astype(o_ref.dtype)


def _pick_tile(dim, target, align):
    """Largest tile <= target that divides dim and is `align`-aligned, else full dim."""
    if dim <= target:
        return dim
    t = (target // align) * align
    while t >= align:
        if dim % t == 0:
            return t
        t -= align
    return dim


def pallas_linear(x2d, w_in_out, *, tm=512, tn=512, tk=1024, compute_dtype=None):
    """y = x2d @ w_in_out with x2d:(M,K) and the weight pre-transposed to (K,N)."""
    M, K = x2d.shape
    Kw, N = w_in_out.shape
    assert K == Kw
    out_dtype = x2d.dtype
    if compute_dtype is not None:            # bf16 MXU operands, f32 accumulation
        x2d = x2d.astype(compute_dtype)
        w_in_out = w_in_out.astype(compute_dtype)

    is_bf16 = (compute_dtype is not None and
               jnp.dtype(compute_dtype) == jnp.dtype(jnp.bfloat16))
    m_align = 16 if is_bf16 else 8           # bf16 packs 16 sublanes per vreg
    tm = _pick_tile(M, tm, m_align)
    tn = _pick_tile(N, tn, 128)              # lane-dense output stores when N >= 128
    tk = _pick_tile(K, tk, 128)
    kt = K // tk

    if kt == 1:
        return pl.pallas_call(
            _matmul_kernel_noacc,
            out_shape=jax.ShapeDtypeStruct((M, N), out_dtype),
            grid_spec=pltpu.PrefetchScalarGridSpec(
                num_scalar_prefetch=0,
                grid=(M // tm, N // tn),
                in_specs=[pl.BlockSpec((tm, tk), lambda i, j: (i, 0)),
                          pl.BlockSpec((tk, tn), lambda i, j: (0, j))],
                out_specs=pl.BlockSpec((tm, tn), lambda i, j: (i, j))),
            compiler_params=pltpu.CompilerParams(
                dimension_semantics=("parallel", "parallel"),
                vmem_limit_bytes=_VMEM_LIMIT),
        )(x2d, w_in_out)

    return pl.pallas_call(
        _matmul_kernel_acc,
        out_shape=jax.ShapeDtypeStruct((M, N), out_dtype),
        grid_spec=pltpu.PrefetchScalarGridSpec(
            num_scalar_prefetch=0,
            grid=(M // tm, N // tn, kt),
            in_specs=[pl.BlockSpec((tm, tk), lambda i, j, k: (i, k)),
                      pl.BlockSpec((tk, tn), lambda i, j, k: (k, j))],
            out_specs=pl.BlockSpec((tm, tn), lambda i, j, k: (i, j)),
            scratch_shapes=[pltpu.VMEM((tm, tn), jnp.float32)]),
        compiler_params=pltpu.CompilerParams(
            dimension_semantics=("parallel", "parallel", "arbitrary"),
            vmem_limit_bytes=_VMEM_LIMIT),
    )(x2d, w_in_out)


# -------------------------- flash attention (batched heads) -------------------

def _flash_attn_kernel(q_ref, k_ref, v_ref, o_ref, m_ref, l_ref, acc_ref, *,
                       scale, compute_dtype, approx_recip):
    """Blocks: q/o (1, H, tq, D); k/v (1, H, tkv, D). Online softmax over KV axis."""
    ki = pl.program_id(2)

    @pl.when(ki == 0)
    def _init():
        m_ref[...] = jnp.full_like(m_ref, -jnp.inf)
        l_ref[...] = jnp.zeros_like(l_ref)
        acc_ref[...] = jnp.zeros_like(acc_ref)

    # Scale folded into q (H*tq*D work instead of H*tq*tkv); cast operands for
    # the MXU, keep all softmax statistics / accumulation in f32.
    q = (q_ref[0] * scale).astype(compute_dtype)       # (H, tq,  D)
    k = k_ref[0].astype(compute_dtype)                 # (H, tkv, D)
    v = v_ref[0].astype(compute_dtype)                 # (H, tkv, D)

    # One batched MXU matmul over all heads (batch dim h), no per-head slicing.
    s = jnp.einsum('hqd,hkd->hqk', q, k,
                   preferred_element_type=jnp.float32)  # (H, tq, tkv) f32

    m_prev = m_ref[...]
    m_new = jnp.maximum(m_prev, jnp.max(s, axis=-1, keepdims=True))
    alpha = jnp.exp(m_prev - m_new)                     # f32 (VPU/EUP)
    p = jnp.exp(s - m_new)                              # f32
    l_ref[...] = alpha * l_ref[...] + jnp.sum(p, axis=-1, keepdims=True)
    acc_ref[...] = alpha * acc_ref[...] + jnp.einsum(
        'hqk,hkd->hqd', p.astype(compute_dtype), v,
        preferred_element_type=jnp.float32)
    m_ref[...] = m_new

    @pl.when(ki == pl.num_programs(2) - 1)
    def _store():
        inv_l = pl.reciprocal(l_ref[...], approx=approx_recip)
        o_ref[0] = (acc_ref[...] * inv_l).astype(o_ref.dtype)


def pallas_attention(q, k, v, *, scale, compute_dtype=None, tq=256, tkv=512):
    """q, k, v in (B, H, N, D) layout; returns (B, H, Nq, D)."""
    B, H, Nq, D = q.shape
    Nk = k.shape[2]
    tq = _pick_tile(Nq, tq, 8)
    tkv = _pick_tile(Nk, tkv, 8)

    cd = q.dtype if compute_dtype is None else compute_dtype
    kernel = functools.partial(_flash_attn_kernel, scale=scale, compute_dtype=cd,
                               approx_recip=(compute_dtype is not None))

    return pl.pallas_call(
        kernel,
        out_shape=jax.ShapeDtypeStruct((B, H, Nq, D), q.dtype),
        grid_spec=pltpu.PrefetchScalarGridSpec(
            num_scalar_prefetch=0,
            grid=(B, Nq // tq, Nk // tkv),
            in_specs=[pl.BlockSpec((1, H, tq, D), lambda b, qi, ki: (b, 0, qi, 0)),
                      pl.BlockSpec((1, H, tkv, D), lambda b, qi, ki: (b, 0, ki, 0)),
                      pl.BlockSpec((1, H, tkv, D), lambda b, qi, ki: (b, 0, ki, 0))],
            out_specs=pl.BlockSpec((1, H, tq, D), lambda b, qi, ki: (b, 0, qi, 0)),
            scratch_shapes=[pltpu.VMEM((H, tq, 1), jnp.float32),   # running max
                            pltpu.VMEM((H, tq, 1), jnp.float32),   # running denom
                            pltpu.VMEM((H, tq, D), jnp.float32)]), # accumulator
        compiler_params=pltpu.CompilerParams(
            dimension_semantics=("parallel", "parallel", "arbitrary"),
            vmem_limit_bytes=_VMEM_LIMIT),
    )(q, k, v)


# ------------------------------- module wrapper -------------------------------

class MultiHeadAttPallas:
    def __init__(self, dim_q, dim_kv, attention_dim, heads=8, dropout=0.0,
                 key=None, matmul_dtype=jnp.bfloat16):
        assert dropout == 0.0, "dropout=0.0 is an identity in the reference"
        assert attention_dim % heads == 0
        self.heads = heads
        self.head_dim = attention_dim // heads
        self.scale = self.head_dim ** (-0.5)
        self.project_out = not (heads == 1 and attention_dim == dim_kv)
        self.matmul_dtype = matmul_dtype   # bf16 MXU operands; None = exact f32

        key = jax.random.PRNGKey(0) if key is None else key
        k1, k2, k3, k4 = jax.random.split(key, 4)

        def init_t(k, out_d, in_d):
            bound = 1.0 / np.sqrt(in_d)
            w = jax.random.uniform(k, (out_d, in_d), jnp.float32, -bound, bound)
            return jnp.transpose(w)        # stored pre-transposed: (in, out)

        self.w_q_t = init_t(k1, attention_dim, dim_q)
        self.w_k_t = init_t(k2, attention_dim, dim_kv)
        self.w_v_t = init_t(k3, attention_dim, dim_kv)   # created, unused (matches ref)
        self.w_out_t = init_t(k4, dim_q, attention_dim) if self.project_out else None

    def __call__(self, x1, x2, x3):
        B, Nq, dim_q = x1.shape
        Nk = x2.shape[1]
        H, D = self.heads, self.head_dim
        A = H * D
        dt = self.matmul_dtype

        # Projections (lane-dense (M, A) outputs). Reference quirk: to_k for v.
        q = pallas_linear(x1.reshape(B * Nq, dim_q), self.w_q_t, compute_dtype=dt)
        k = pallas_linear(x2.reshape(B * Nk, -1), self.w_k_t, compute_dtype=dt)
        v = pallas_linear(x3.reshape(B * Nk, -1), self.w_k_t, compute_dtype=dt)

        # Head split at the XLA level so the attention kernel sees (H, N, D)
        # blocks and needs zero in-kernel relayouts.
        def split(t, n):
            return t.reshape(B, n, H, D).transpose(0, 2, 1, 3)   # (B, H, N, D)

        out = pallas_attention(split(q, Nq), split(k, Nk), split(v, Nk),
                               scale=self.scale, compute_dtype=dt)
        out = out.transpose(0, 2, 1, 3).reshape(B, Nq, A)        # merge heads

        if self.project_out:
            out = pallas_linear(out.reshape(B * Nq, A), self.w_out_t,
                                compute_dtype=dt).reshape(B, Nq, -1)
        return out


# ------------------------------- reference (plain JAX) ------------------------

def reference_forward(mod, x1, x2, x3):
    B, Nq, _ = x1.shape
    Nk = x2.shape[1]
    H, D = mod.heads, mod.head_dim
    q = x1 @ mod.w_q_t
    k = x2 @ mod.w_k_t
    v = x3 @ mod.w_k_t          # reference quirk: to_k used for v
    q = q.reshape(B, Nq, H, D).transpose(0, 2, 1, 3)
    k = k.reshape(B, Nk, H, D).transpose(0, 2, 1, 3)
    v = v.reshape(B, Nk, H, D).transpose(0, 2, 1, 3)
    dots = jnp.einsum('bhnd,bhmd->bhnm', q, k) * mod.scale
    attn = jax.nn.softmax(dots, axis=-1)
    out = jnp.einsum('bhnm,bhmd->bhnd', attn, v)
    out = out.transpose(0, 2, 1, 3).reshape(B, Nq, H * D)
    if mod.project_out:
        out = out @ mod.w_out_t
    return out


# ------------------------------- main ------------------------------------------

if __name__ == "__main__":
    B, Nq, Nkv = 2, 8, 8
    dim_q, dim_kv, attention_dim, heads = 32, 32, 64, 8

    key = jax.random.PRNGKey(0)
    kx1, kx2, kx3, kp = jax.random.split(key, 4)
    x1 = jax.random.normal(kx1, (B, Nq, dim_q), jnp.float32)
    x2 = jax.random.normal(kx2, (B, Nkv, dim_kv), jnp.float32)
    x3 = jax.random.normal(kx3, (B, Nkv, dim_kv), jnp.float32)

    mod = MultiHeadAttPallas(dim_q, dim_kv, attention_dim, heads=heads, key=kp,
                             matmul_dtype=jnp.bfloat16)
    ref = reference_forward(mod, x1, x2, x3)

    # bf16 MXU-operand path (default): loose tolerance.
    out_bf16 = jax.block_until_ready(jax.jit(mod.__call__)(x1, x2, x3))
    assert out_bf16.shape == (B, Nq, dim_q), out_bf16.shape
    np.testing.assert_allclose(np.asarray(out_bf16), np.asarray(ref),
                               rtol=5e-2, atol=5e-2)

    # Exact f32 path (matmul_dtype=None, exact reciprocal): tight tolerance.
    mod.matmul_dtype = None
    out_f32 = jax.block_until_ready(jax.jit(mod.__call__)(x1, x2, x3))
    np.testing.assert_allclose(np.asarray(out_f32), np.asarray(ref),
                               rtol=2e-3, atol=2e-3)

    print("KERNEL_OK")
</pallas_src>

<mosaic_0001>
module attributes {stable_mosaic.version = 11 : i64} {
  func.func @_matmul_kernel_noacc(%arg0: i32, %arg1: i32, %arg2: memref<16x32xbf16, #tpu.memory_space<vmem>>, %arg3: memref<32x64xbf16, #tpu.memory_space<vmem>>, %arg4: memref<16x64xf32, #tpu.memory_space<vmem>>) attributes {dimension_semantics = [#tpu.dimension_semantics<parallel>, #tpu.dimension_semantics<parallel>], iteration_bounds = array<i64: 1, 1>, scalar_prefetch = 0 : i64, scratch_operands = 0 : i64, tpu.core_type = #tpu.core_type<tc>, window_params = [{transform_indices = @transform_0, window_bounds = array<i64: 16, 32>}, {transform_indices = @transform_1, window_bounds = array<i64: 32, 64>}, {transform_indices = @transform_2, window_bounds = array<i64: 16, 64>}]} {
    %c0 = arith.constant 0 : index
    %c0_0 = arith.constant 0 : index
    %0 = vector.load %arg2[%c0, %c0_0] : memref<16x32xbf16, #tpu.memory_space<vmem>>, vector<16x32xbf16>
    %c0_1 = arith.constant 0 : index
    %c0_2 = arith.constant 0 : index
    %1 = vector.load %arg3[%c0_1, %c0_2] : memref<32x64xbf16, #tpu.memory_space<vmem>>, vector<32x64xbf16>
    %cst = arith.constant dense<0.000000e+00> : vector<16x64xf32>
    %2 = tpu.matmul %0, %1, %cst {dimension_numbers = #tpu.dot_dimension_numbers<[1], [0], [0], [1], [0, 0, 1, 1], [], []>} : vector<16x32xbf16>, vector<32x64xbf16>, vector<16x64xf32> -> vector<16x64xf32>
    %c0_3 = arith.constant 0 : index
    %c0_4 = arith.constant 0 : index
    %3 = vector.load %arg4[%c0_3, %c0_4] : memref<16x64xf32, #tpu.memory_space<vmem>>, vector<16x64xf32>
    tpu.vector_store %arg4[%c0_3, %c0_4], %2 {strides = array<i32>} : memref<16x64xf32, #tpu.memory_space<vmem>>, vector<16x64xf32>,
    return
  }
  func.func @transform_0(%arg0: i32, %arg1: i32) -> (i32, i32) {
    %c0_i32 = arith.constant 0 : i32
    %c0_i32_0 = arith.constant 0 : i32
    return %arg0, %c0_i32 : i32, i32
  }
  func.func @transform_1(%arg0: i32, %arg1: i32) -> (i32, i32) {
    %c0_i32 = arith.constant 0 : i32
    %c0_i32_0 = arith.constant 0 : i32
    return %c0_i32, %arg1 : i32, i32
  }
  func.func @transform_2(%arg0: i32, %arg1: i32) -> (i32, i32) {
    %c0_i32 = arith.constant 0 : i32
    return %arg0, %arg1 : i32, i32
  }
}

module attributes {stable_mosaic.version = 11 : i64} {
  func.func @_matmul_kernel_noacc(%arg0: i32, %arg1: i32, %arg2: memref<16x32xbf16, #tpu.memory_space<vmem>>, %arg3: memref<32x64xbf16, #tpu.memory_space<vmem>>, %arg4: memref<16x64xf32, #tpu.memory_space<vmem>>) attributes {dimension_semantics = [#tpu.dimension_semantics<parallel>, #tpu.dimension_semantics<parallel>], iteration_bounds = array<i64: 1, 1>, scalar_prefetch = 0 : i64, scratch_operands = 0 : i64, tpu.core_type = #tpu.core_type<tc>, window_params = [{transform_indices = @transform_0, window_bounds = array<i64: 16, 32>}, {transform_indices = @transform_1, window_bounds = array<i64: 32, 64>}, {transform_indices = @transform_2, window_bounds = array<i64: 16, 64>}]} {
    %c0 = arith.constant 0 : index
    %c0_0 = arith.constant 0 : index
    %0 = vector.load %arg2[%c0, %c0_0] : memref<16x32xbf16, #tpu.memory_space<vmem>>, vector<16x32xbf16>
    %c0_1 = arith.constant 0 : index
    %c0_2 = arith.constant 0 : index
    %1 = vector.load %arg3[%c0_1, %c0_2] : memref<32x64xbf16, #tpu.memory_space<vmem>>, vector<32x64xbf16>
    %cst = arith.constant dense<0.000000e+00> : vector<16x64xf32>
    %2 = tpu.matmul %0, %1, %cst {dimension_numbers = #tpu.dot_dimension_numbers<[1], [0], [0], [1], [0, 0, 1, 1], [], []>} : vector<16x32xbf16>, vector<32x64xbf16>, vector<16x64xf32> -> vector<16x64xf32>
    %c0_3 = arith.constant 0 : index
    %c0_4 = arith.constant 0 : index
    %3 = vector.load %arg4[%c0_3, %c0_4] : memref<16x64xf32, #tpu.memory_space<vmem>>, vector<16x64xf32>
    tpu.vector_store %arg4[%c0_3, %c0_4], %2 {strides = array<i32>} : memref<16x64xf32, #tpu.memory_space<vmem>>, vector<16x64xf32>,
    return
  }
  func.func @transform_0(%arg0: i32, %arg1: i32) -> (i32, i32) {
    %c0_i32 = arith.constant 0 : i32
    %c0_i32_0 = arith.constant 0 : i32
    return %arg0, %c0_i32 : i32, i32
  }
  func.func @transform_1(%arg0: i32, %arg1: i32) -> (i32, i32) {
    %c0_i32 = arith.constant 0 : i32
    %c0_i32_0 = arith.constant 0 : i32
    return %c0_i32, %arg1 : i32, i32
  }
  func.func @transform_2(%arg0: i32, %arg1: i32) -> (i32, i32) {
    %c0_i32 = arith.constant 0 : i32
    return %arg0, %arg1 : i32, i32
  }
}

module attributes {stable_mosaic.version = 11 : i64} {
  func.func @_flash_attn_kernel(%arg0: i32, %arg1: i32, %arg2: i32, %arg3: memref<1x8x8x8xf32, #tpu.memory_space<vmem>>, %arg4: memref<1x8x8x8xf32, #tpu.memory_space<vmem>>, %arg5: memref<1x8x8x8xf32, #tpu.memory_space<vmem>>, %arg6: memref<1x8x8x8xf32, #tpu.memory_space<vmem>>, %arg7: memref<8x8x1xf32, #tpu.memory_space<vmem>>, %arg8: memref<8x8x1xf32, #tpu.memory_space<vmem>>, %arg9: memref<8x8x8xf32, #tpu.memory_space<vmem>>) attributes {dimension_semantics = [#tpu.dimension_semantics<parallel>, #tpu.dimension_semantics<parallel>, #tpu.dimension_semantics<arbitrary>], iteration_bounds = array<i64: 2, 1, 1>, scalar_prefetch = 0 : i64, scratch_operands = 3 : i64, tpu.core_type = #tpu.core_type<tc>, window_params = [{transform_indices = @transform_0, window_bounds = array<i64: 1, 8, 8, 8>}, {transform_indices = @transform_1, window_bounds = array<i64: 1, 8, 8, 8>}, {transform_indices = @transform_2, window_bounds = array<i64: 1, 8, 8, 8>}, {transform_indices = @transform_3, window_bounds = array<i64: 1, 8, 8, 8>}]} {
    %c0_i32 = arith.constant 0 : i32
    %0 = arith.cmpi eq, %arg2, %c0_i32 : i32
    %1 = arith.extui %0 : i1 to i32
    %c0_i32_0 = arith.constant 0 : i32
    %2 = arith.cmpi ne, %1, %c0_i32_0 : i32
    scf.if %2 {
      %cst_36 = arith.constant 0xFF800000 : f32
      %41 = vector.broadcast %cst_36 : f32 to vector<8x8x1xf32>
      %c0_37 = arith.constant 0 : index
      %c0_38 = arith.constant 0 : index
      %c0_39 = arith.constant 0 : index
      %42 = vector.load %arg7[%c0_37, %c0_38, %c0_39] : memref<8x8x1xf32, #tpu.memory_space<vmem>>, vector<8x8x1xf32>
      tpu.vector_store %arg7[%c0_37, %c0_38, %c0_39], %41 {strides = array<i32>} : memref<8x8x1xf32, #tpu.memory_space<vmem>>, vector<8x8x1xf32>,
      %cst_40 = arith.constant 0.000000e+00 : f32
      %43 = vector.broadcast %cst_40 : f32 to vector<8x8x1xf32>
      %c0_41 = arith.constant 0 : index
      %c0_42 = arith.constant 0 : index
      %c0_43 = arith.constant 0 : index
      %44 = vector.load %arg8[%c0_41, %c0_42, %c0_43] : memref<8x8x1xf32, #tpu.memory_space<vmem>>, vector<8x8x1xf32>
      tpu.vector_store %arg8[%c0_41, %c0_42, %c0_43], %43 {strides = array<i32>} : memref<8x8x1xf32, #tpu.memory_space<vmem>>, vector<8x8x1xf32>,
      %cst_44 = arith.constant 0.000000e+00 : f32
      %45 = vector.broadcast %cst_44 : f32 to vector<8x8x8xf32>
      %c0_45 = arith.constant 0 : index
      %c0_46 = arith.constant 0 : index
      %c0_47 = arith.constant 0 : index
      %46 = vector.load %arg9[%c0_45, %c0_46, %c0_47] : memref<8x8x8xf32, #tpu.memory_space<vmem>>, vector<8x8x8xf32>
      tpu.vector_store %arg9[%c0_45, %c0_46, %c0_47], %45 {strides = array<i32>} : memref<8x8x8xf32, #tpu.memory_space<vmem>>, vector<8x8x8xf32>,
    } else {
    }
    %c0 = arith.constant 0 : index
    %c0_1 = arith.constant 0 : index
    %c0_2 = arith.constant 0 : index
    %c0_3 = arith.constant 0 : index
    %3 = vector.load %arg3[%c0, %c0_1, %c0_2, %c0_3] : memref<1x8x8x8xf32, #tpu.memory_space<vmem>>, vector<1x8x8x8xf32>
    %4 = vector.shape_cast %3 : vector<1x8x8x8xf32> to vector<8x8x8xf32>
    %cst = arith.constant 0.353553385 : f32
    %5 = vector.broadcast %cst : f32 to vector<8x8x8xf32>
    %6 = arith.mulf %4, %5 : vector<8x8x8xf32>
    %7 = arith.truncf %6 : vector<8x8x8xf32> to vector<8x8x8xbf16>
    %c0_4 = arith.constant 0 : index
    %c0_5 = arith.constant 0 : index
    %c0_6 = arith.constant 0 : index
    %c0_7 = arith.constant 0 : index
    %8 = vector.load %arg4[%c0_4, %c0_5, %c0_6, %c0_7] : memref<1x8x8x8xf32, #tpu.memory_space<vmem>>, vector<1x8x8x8xf32>
    %9 = vector.shape_cast %8 : vector<1x8x8x8xf32> to vector<8x8x8xf32>
    %10 = arith.truncf %9 : vector<8x8x8xf32> to vector<8x8x8xbf16>
    %c0_8 = arith.constant 0 : index
    %c0_9 = arith.constant 0 : index
    %c0_10 = arith.constant 0 : index
    %c0_11 = arith.constant 0 : index
    %11 = vector.load %arg5[%c0_8, %c0_9, %c0_10, %c0_11] : memref<1x8x8x8xf32, #tpu.memory_space<vmem>>, vector<1x8x8x8xf32>
    %12 = vector.shape_cast %11 : vector<1x8x8x8xf32> to vector<8x8x8xf32>
    %13 = arith.truncf %12 : vector<8x8x8xf32> to vector<8x8x8xbf16>
    "tpu.trace_start"() <{level = 10 : i32, message = "hqd,hkd->hqk"}> : () -> ()
    %cst_12 = arith.constant dense<0.000000e+00> : vector<8x8x8xf32>
    %14 = tpu.matmul %7, %10, %cst_12 {dimension_numbers = #tpu.dot_dimension_numbers<[2], [2], [1], [1], [0, 0, 0, 1, 1, 1], [0], [0]>} : vector<8x8x8xbf16>, vector<8x8x8xbf16>, vector<8x8x8xf32> -> vector<8x8x8xf32>
    "tpu.trace_stop"() : () -> ()
    %c0_13 = arith.constant 0 : index
    %c0_14 = arith.constant 0 : index
    %c0_15 = arith.constant 0 : index
    %15 = vector.load %arg7[%c0_13, %c0_14, %c0_15] : memref<8x8x1xf32, #tpu.memory_space<vmem>>, vector<8x8x1xf32>
    %cst_16 = arith.constant dense<0xFF800000> : vector<8x8xf32>
    %16 = vector.multi_reduction <maximumf>, %14, %cst_16 [2] : vector<8x8x8xf32> to vector<8x8xf32>
    %17 = vector.shape_cast %16 : vector<8x8xf32> to vector<8x8x1xf32>
    %18 = arith.maximumf %15, %17 : vector<8x8x1xf32>
    %19 = arith.subf %15, %18 : vector<8x8x1xf32>
    %20 = math.exp %19 : vector<8x8x1xf32>
    %21 = vector.broadcast %18 : vector<8x8x1xf32> to vector<8x8x8xf32>
    %22 = arith.subf %14, %21 : vector<8x8x8xf32>
    %23 = math.exp %22 : vector<8x8x8xf32>
    %c0_17 = arith.constant 0 : index
    %c0_18 = arith.constant 0 : index
    %c0_19 = arith.constant 0 : index
    %24 = vector.load %arg8[%c0_17, %c0_18, %c0_19] : memref<8x8x1xf32, #tpu.memory_space<vmem>>, vector<8x8x1xf32>
    %25 = arith.mulf %20, %24 : vector<8x8x1xf32>
    %cst_20 = arith.constant dense<0.000000e+00> : vector<8x8xf32>
    %26 = vector.multi_reduction <add>, %23, %cst_20 [2] : vector<8x8x8xf32> to vector<8x8xf32>
    %27 = vector.shape_cast %26 : vector<8x8xf32> to vector<8x8x1xf32>
    %28 = arith.addf %25, %27 : vector<8x8x1xf32>
    %c0_21 = arith.constant 0 : index
    %c0_22 = arith.constant 0 : index
    %c0_23 = arith.constant 0 : index
    %29 = vector.load %arg8[%c0_21, %c0_22, %c0_23] : memref<8x8x1xf32, #tpu.memory_space<vmem>>, vector<8x8x1xf32>
    tpu.vector_store %arg8[%c0_21, %c0_22, %c0_23], %28 {strides = array<i32>} : memref<8x8x1xf32, #tpu.memory_space<vmem>>, vector<8x8x1xf32>,
    %c0_24 = arith.constant 0 : index
    %c0_25 = arith.constant 0 : index
    %c0_26 = arith.constant 0 : index
    %30 = vector.load %arg9[%c0_24, %c0_25, %c0_26] : memref<8x8x8xf32, #tpu.memory_space<vmem>>, vector<8x8x8xf32>
    %31 = vector.broadcast %20 : vector<8x8x1xf32> to vector<8x8x8xf32>
    %32 = arith.mulf %31, %30 : vector<8x8x8xf32>
    %33 = arith.truncf %23 : vector<8x8x8xf32> to vector<8x8x8xbf16>
    "tpu.trace_start"() <{level = 10 : i32, message = "hqk,hkd->hqd"}> : () -> ()
    %cst_27 = arith.constant dense<0.000000e+00> : vector<8x8x8xf32>
    %34 = tpu.matmul %33, %13, %cst_27 {dimension_numbers = #tpu.dot_dimension_numbers<[2], [1], [1], [2], [0, 0, 0, 1, 1, 2], [0], [0]>} : vector<8x8x8xbf16>, vector<8x8x8xbf16>, vector<8x8x8xf32> -> vector<8x8x8xf32>
    "tpu.trace_stop"() : () -> ()
    %35 = arith.addf %32, %34 : vector<8x8x8xf32>
    %c0_28 = arith.constant 0 : index
    %c0_29 = arith.constant 0 : index
    %c0_30 = arith.constant 0 : index
    %36 = vector.load %arg9[%c0_28, %c0_29, %c0_30] : memref<8x8x8xf32, #tpu.memory_space<vmem>>, vector<8x8x8xf32>
    tpu.vector_store %arg9[%c0_28, %c0_29, %c0_30], %35 {strides = array<i32>} : memref<8x8x8xf32, #tpu.memory_space<vmem>>, vector<8x8x8xf32>,
    %c0_31 = arith.constant 0 : index
    %c0_32 = arith.constant 0 : index
    %c0_33 = arith.constant 0 : index
    %37 = vector.load %arg7[%c0_31, %c0_32, %c0_33] : memref<8x8x1xf32, #tpu.memory_space<vmem>>, vector<8x8x1xf32>
    tpu.vector_store %arg7[%c0_31, %c0_32, %c0_33], %18 {strides = array<i32>} : memref<8x8x1xf32, #tpu.memory_space<vmem>>, vector<8x8x1xf32>,
    %c0_i32_34 = arith.constant 0 : i32
    %38 = arith.cmpi eq, %arg2, %c0_i32_34 : i32
    %39 = arith.extui %38 : i1 to i32
    %c0_i32_35 = arith.constant 0 : i32
    %40 = arith.cmpi ne, %39, %c0_i32_35 : i32
    scf.if %40 {
      %c0_36 = arith.constant 0 : index
      %c0_37 = arith.constant 0 : index
      %c0_38 = arith.constant 0 : index
      %41 = vector.load %arg8[%c0_36, %c0_37, %c0_38] : memref<8x8x1xf32, #tpu.memory_space<vmem>>, vector<8x8x1xf32>
      %42 = tpu.reciprocal %41 {approx = true} : vector<8x8x1xf32> -> vector<8x8x1xf32>
      %c0_39 = arith.constant 0 : index
      %c0_40 = arith.constant 0 : index
      %c0_41 = arith.constant 0 : index
      %43 = vector.load %arg9[%c0_39, %c0_40, %c0_41] : memref<8x8x8xf32, #tpu.memory_space<vmem>>, vector<8x8x8xf32>
      %44 = vector.broadcast %42 : vector<8x8x1xf32> to vector<8x8x8xf32>
      %45 = arith.mulf %43, %44 : vector<8x8x8xf32>
      %c0_42 = arith.constant 0 : index
      %c0_43 = arith.constant 0 : index
      %c0_44 = arith.constant 0 : index
      %c0_45 = arith.constant 0 : index
      %46 = vector.load %arg6[%c0_42, %c0_43, %c0_44, %c0_45] : memref<1x8x8x8xf32, #tpu.memory_space<vmem>>, vector<1x8x8x8xf32>
      %47 = vector.shape_cast %46 : vector<1x8x8x8xf32> to vector<8x8x8xf32>
      %48 = vector.shape_cast %45 : vector<8x8x8xf32> to vector<1x8x8x8xf32>
      tpu.vector_store %arg6[%c0_42, %c0_43, %c0_44, %c0_45], %48 {strides = array<i32>} : memref<1x8x8x8xf32, #tpu.memory_space<vmem>>, vector<1x8x8x8xf32>,
    } else {
    }
    return
  }
  func.func @transform_0(%arg0: i32, %arg1: i32, %arg2: i32) -> (i32, i32, i32, i32) {
    %c0_i32 = arith.constant 0 : i32
    %c0_i32_0 = arith.constant 0 : i32
    %c0_i32_1 = arith.constant 0 : i32
    return %arg0, %c0_i32, %arg1, %c0_i32_0 : i32, i32, i32, i32
  }
  func.func @transform_1(%arg0: i32, %arg1: i32, %arg2: i32) -> (i32, i32, i32, i32) {
    %c0_i32 = arith.constant 0 : i32
    %c0_i32_0 = arith.constant 0 : i32
    %c0_i32_1 = arith.constant 0 : i32
    return %arg0, %c0_i32, %arg2, %c0_i32_0 : i32, i32, i32, i32
  }
  func.func @transform_2(%arg0: i32, %arg1: i32, %arg2: i32) -> (i32, i32, i32, i32) {
    %c0_i32 = arith.constant 0 : i32
    %c0_i32_0 = arith.constant 0 : i32
    %c0_i32_1 = arith.constant 0 : i32
    return %arg0, %c0_i32, %arg2, %c0_i32_0 : i32, i32, i32, i32
  }
  func.func @transform_3(%arg0: i32, %arg1: i32, %arg2: i32) -> (i32, i32, i32, i32) {
    %c0_i32 = arith.constant 0 : i32
    %c0_i32_0 = arith.constant 0 : i32
    %c0_i32_1 = arith.constant 0 : i32
    return %arg0, %c0_i32, %arg1, %c0_i32_0 : i32, i32, i32, i32
  }
}

module attributes {stable_mosaic.version = 11 : i64} {
  func.func @_matmul_kernel_noacc(%arg0: i32, %arg1: i32, %arg2: memref<16x64xbf16, #tpu.memory_space<vmem>>, %arg3: memref<64x32xbf16, #tpu.memory_space<vmem>>, %arg4: memref<16x32xf32, #tpu.memory_space<vmem>>) attributes {dimension_semantics = [#tpu.dimension_semantics<parallel>, #tpu.dimension_semantics<parallel>], iteration_bounds = array<i64: 1, 1>, scalar_prefetch = 0 : i64, scratch_operands = 0 : i64, tpu.core_type = #tpu.core_type<tc>, window_params = [{transform_indices = @transform_0, window_bounds = array<i64: 16, 64>}, {transform_indices = @transform_1, window_bounds = array<i64: 64, 32>}, {transform_indices = @transform_2, window_bounds = array<i64: 16, 32>}]} {
    %c0 = arith.constant 0 : index
    %c0_0 = arith.constant 0 : index
    %0 = vector.load %arg2[%c0, %c0_0] : memref<16x64xbf16, #tpu.memory_space<vmem>>, vector<16x64xbf16>
    %c0_1 = arith.constant 0 : index
    %c0_2 = arith.constant 0 : index
    %1 = vector.load %arg3[%c0_1, %c0_2] : memref<64x32xbf16, #tpu.memory_space<vmem>>, vector<64x32xbf16>
    %cst = arith.constant dense<0.000000e+00> : vector<16x32xf32>
    %2 = tpu.matmul %0, %1, %cst {dimension_numbers = #tpu.dot_dimension_numbers<[1], [0], [0], [1], [0, 0, 1, 1], [], []>} : vector<16x64xbf16>, vector<64x32xbf16>, vector<16x32xf32> -> vector<16x32xf32>
    %c0_3 = arith.constant 0 : index
    %c0_4 = arith.constant 0 : index
    %3 = vector.load %arg4[%c0_3, %c0_4] : memref<16x32xf32, #tpu.memory_space<vmem>>, vector<16x32xf32>
    tpu.vector_store %arg4[%c0_3, %c0_4], %2 {strides = array<i32>} : memref<16x32xf32, #tpu.memory_space<vmem>>, vector<16x32xf32>,
    return
  }
  func.func @transform_0(%arg0: i32, %arg1: i32) -> (i32, i32) {
    %c0_i32 = arith.constant 0 : i32
    %c0_i32_0 = arith.constant 0 : i32
    return %arg0, %c0_i32 : i32, i32
  }
  func.func @transform_1(%arg0: i32, %arg1: i32) -> (i32, i32) {
    %c0_i32 = arith.constant 0 : i32
    %c0_i32_0 = arith.constant 0 : i32
    return %c0_i32, %arg1 : i32, i32
  }
  func.func @transform_2(%arg0: i32, %arg1: i32) -> (i32, i32) {
    %c0_i32 = arith.constant 0 : i32
    return %arg0, %arg1 : i32, i32
  }
}

</mosaic_0001>

<bundles_post_ra>
// kernel: a_call__.5
= control target key start
LH: loop header
LB: loop body
LE: loop exit
PB: predicated region body
PF: predicated region fallthrough
CT: control target
= control target key end

     0   :  { %7 = vsyncpa [#allocation3], 0  ;;  %s122_s12 = smov [#allocation2]   ;;  %s123_s14 = smov 64   ;;  %s152_s0 = inlined_call_operand.vmem [shape: bf16[16,32], index: 0, kind: input, shape index: {}]   ;;  %s153_s1 = inlined_call_operand.hbm [shape: bf16[32,64], index: 1, kind: input, shape index: {}]   ;;  %s154_s2 = inlined_call_operand.vmem [shape: f32[16,64], index: 2, kind: output, shape index: {}]  }
   0x1   :  { %s14_s11 = sshll.u32 %s153_s1, 4  ;;  %s16_s13 = sshll.u32 %s122_s12, 4  ;;  %s15_s11 = int_to_ptr.hbm [resolvable:$true] %s14_s11  ;;  %s17_s13 = int_to_ptr.vmem [resolvable:$true] %s16_s13 }
   0x2   :  { %s124_s15 = smov 4  }
   0x3   :  { %22 = dma.hbm_to_vmem [thread:$0]  %s15_s11, 256, %s17_s13, [#allocation3], %s123_s14, %s123_s14, %s124_s15  }
   0x4   :  { %120 = dma.done.wait [#allocation3], 256  }
   0x5   :  { %121 = vsyncadd [#allocation3], 4294967040  ;;  %v92_v0 = vld [vmem:[#allocation2 + $0x8] sm:$0xff]  ;;  %v91_v1 = vld [vmem:[#allocation2] sm:$0xff]  ;;  %vm51_vm0 = vcmask 261120   ;;  %vm69_vm1 = vcmask 523264  }
   0x6   :  { %61 = vmatpush.bf16.msra.mxu0 %v92_v0  ;;  %v90_v2 = vld [vmem:[%s152_s0] sm:$0xff] }
   0xa   :  { %62 = vmatpush.bf16.msra.mxu0 %v91_v1 }
   0xd   :  { %89 = vmatmul.msk.bf16.vlgmr.msra.gmra.mxu0 %vm51_vm0, %v90_v2 }
  0x8a   :  { %v64_v3 = vpop.f32.mrf.mxu0 }
  0x8b   :  { %70 = vst.msk [vmem:[%s154_s2] sm:$0xff] %vm69_vm1, %v64_v3 }
  0x92   :  { %v66_v4 = vpop.f32.mrf.mxu0 }
  0x93   :  { %71 = vst.msk [vmem:[%s154_s2 + $0x8] sm:$0xff] %vm69_vm1, %v66_v4 }
  0x94   :  { %76 = vsyncpa [#allocation3], 1 }

// kernel: a_call__.6
= control target key start
LH: loop header
LB: loop body
LE: loop exit
PB: predicated region body
PF: predicated region fallthrough
CT: control target
= control target key end

     0   :  { %vm35_vm0 = vcmask 261120   ;;  %vm53_vm1 = vcmask 523264   ;;  %s106_s1 = inlined_call_operand.vmem [shape: bf16[32,64], index: 1, kind: input, shape index: {}]   ;;  %s107_s0 = inlined_call_operand.vmem [shape: bf16[16,32], index: 0, kind: input, shape index: {}]   ;;  %s108_s2 = inlined_call_operand.vmem [shape: f32[16,64], index: 2, kind: output, shape index: {}]  }
   0x1   :  { %v75_v0 = vld [vmem:[%s106_s1 + $0x8] sm:$0xff]  ;;  %v74_v1 = vld [vmem:[%s106_s1] sm:$0xff] }
   0x2   :  { %45 = vmatpush.bf16.msra.mxu0 %v75_v0  ;;  %v73_v2 = vld [vmem:[%s107_s0] sm:$0xff] }
   0x6   :  { %46 = vmatpush.bf16.msra.mxu0 %v74_v1 }
   0x9   :  { %72 = vmatmul.msk.bf16.vlgmr.msra.gmra.mxu0 %vm35_vm0, %v73_v2 }
  0x86   :  { %v48_v3 = vpop.f32.mrf.mxu0 }
  0x87   :  { %54 = vst.msk [vmem:[%s108_s2] sm:$0xff] %vm53_vm1, %v48_v3 }
  0x8e   :  { %v50_v4 = vpop.f32.mrf.mxu0 }
  0x8f   :  { %55 = vst.msk [vmem:[%s108_s2 + $0x8] sm:$0xff] %vm53_vm1, %v50_v4 }

// kernel: a_call__.9
= control target key start
LH: loop header
LB: loop body
LE: loop exit
PB: predicated region body
PF: predicated region fallthrough
CT: control target
= control target key end

     0   :  { %s182_s0 = inlined_call_operand.vmem [shape: bf16[16,64], index: 0, kind: input, shape index: {}]   ;;  %s183_s1 = inlined_call_operand.vmem [shape: bf16[64,32], index: 1, kind: input, shape index: {}]   ;;  %s184_s2 = inlined_call_operand.hbm [shape: f32[16,32], index: 2, kind: output, shape index: {}]  }
   0x1   :  { %v116_v0 = vld [vmem:[%s183_s1 + $0x18] sm:$0xff] }
   0x2   :  { %7 = vsyncpa [#allocation3], 0  ;;  %60 = vmatpush.bf16.msra.mxu0 %v116_v0  ;;  %v115_v1 = vld [vmem:[%s183_s1 + $0x10] sm:$0xff]  ;;  %v114_v2 = vld [vmem:[%s183_s1 + $0x8] sm:$0xff]  ;;  %vm52_vm0 = vcmask 523264   ;;  %vm70_vm1 = vcmask 261120  }
   0x3   :  { %v113_v3 = vld [vmem:[%s183_s1] sm:$0xff]  ;;  %s146_s19 = smov [#allocation2]   ;;  %s79_s23 = sshll.u32 %s184_s2, 4  ;;  %s80_s23 = int_to_ptr.hbm [resolvable:$true] %s79_s23 }
   0x4   :  { %v112_v4 = vld [vmem:[%s182_s0] sm:$0xff]  ;;  %s77_s20 = sshll.u32 %s146_s19, 4  ;;  %s147_s1 = smov 128   ;;  %s78_s20 = int_to_ptr.vmem [resolvable:$true] %s77_s20 }
   0x5   :  { %s148_s24 = smov 8  }
   0x6   :  { %61 = vmatpush.bf16.msra.mxu0 %v115_v1 }
   0xa   :  { %62 = vmatpush.bf16.msra.mxu0 %v114_v2 }
   0xe   :  { %63 = vmatpush.bf16.msra.mxu0 %v113_v3 }
  0x11   :  { %111 = vmatmul.msk.bf16.vlgmr.msra.gmra.mxu0 %vm52_vm0, %v112_v4 }
  0x8e   :  { %v65_v5 = vpop.f32.mrf.mxu0 }
  0x8f   :  { %71 = vst.msk [vmem:[#allocation2] sm:$0xff] %vm70_vm1, %v65_v5 }
  0x96   :  { %v67_v6 = vpop.f32.mrf.mxu0 }
  0x97   :  { %72 = vst.msk [vmem:[#allocation2 + $0x8] sm:$0xff] %vm70_vm1, %v67_v6 }
  0x98   :  { %85 = dma.vmem_to_hbm [thread:$0]  %s78_s20, 256, %s80_s23, [#allocation3], %s147_s1, %s147_s1, %s148_s24  }
  0x99   :  { %144 = dma.done.wait [#allocation3], 256  }
  0x9a   :  { %145 = vsyncadd [#allocation3], 4294967040 }
  0x9b   :  { %90 = vsyncpa [#allocation3], 1 }

// kernel: a_call__.8
= control target key start
LH: loop header
LB: loop body
LE: loop exit
PB: predicated region body
PF: predicated region fallthrough
CT: control target
= control target key end

     0   :  { %s1302_s12 = smov 0   ;;  %s1304_s13 = smov 0   ;;  %s1566_s0 = inlined_call_operand.vmem [shape: f32[2,8,8,8], index: 0, kind: input, shape index: {}]   ;;  %s1567_s1 = inlined_call_operand.vmem [shape: f32[2,8,8,8], index: 1, kind: input, shape index: {}]   ;;  %s1568_s2 = inlined_call_operand.vmem [shape: f32[2,8,8,8], index: 2, kind: input, shape index: {}]   ;;  %s1569_s3 = inlined_call_operand.vmem [shape: f32[2,8,8,8], index: 3, kind: output, shape index: {}]  }
   0x1   :  { %s1306_s14 = smov 0  }
   0x2 LB: > { %s32_s15 = sadd.s32 1, %s1273_s13  ;;  %p1146_p0 = scmp.ge.s32.totalorder %s1277_s14, 1  ;;  %s1277_s14 = sphi %s1306_s14, %s13_s14   ;;  %s1273_s13 = sphi %s1304_s13, %s1571_s13   ;;  %s1269_s12 = sphi %s1302_s12, %s1570_s12  }
   0x3   : > { %p34_p1 = scmp.ge.s32.totalorder %s32_s15, 2  ;;  %p193_p2 = scmp.lt.s32.totalorder %s1277_s14, 3 }
   0x5   : > { %s1573_s15 = smov (%p34_p1, %s32_s15), 0  ;;  %p194_p3 = pnand %p1146_p0, %p193_p2 }
   0x6   : > { %p239_p4 = scmp.lt.s32.totalorder (!%p194_p3), %s1269_s12, 1 }
   0x7   : > { %197 = sbr.rel (%p194_p3) target bundleno = 687 (0x2af), region = 32 }
   0xc   : > { %s1575_s12 = smov (!%p239_p4, %s1269_s12), 1  ;;  %vm293_vm0 = vcmask 64512   ;;  %vm276_vm1 = vcmask 7168   ;;  %v1279_v50 = vmov -inf   ;;  %vm763_vm2 = vcmask 1043456  }
   0xd   : > { %s1320_s16 = sshll.u32 %s1575_s12, 6  ;;  %277 = vst.msk [vmem:[#allocation2] sm:$0xff] %vm276_vm1, %v1279_v50 }
   0xe   : > { %s254_s19 = scalar_lea.vmem %s1567_s1, %s1320_s16  ;;  %s1330_s22 = scalar_lea.vmem %s1566_s0, %s1320_s16  ;;  %278 = vst.msk [vmem:[#allocation2 + $0x8] sm:$0xff] %vm276_vm1, %v1279_v50 }
   0xf   : > { %v326_v0 = vld [vmem:[%s254_s19] sm:$0xff]  ;;  %v328_v1 = vld [vmem:[%s254_s19 + $0x10] sm:$0xff]  ;;  %v329_v2 = vld [vmem:[%s254_s19 + $0x18] sm:$0xff]  ;;  %279 = vst.msk [vmem:[#allocation2 + $0x10] sm:$0xff] %vm276_vm1, %v1279_v50  ;;  %s1454_s25 = scalar_lea.vmem %s1568_s2, %s1320_s16  ;;  %s1539_s28 = scalar_lea.vmem %s1569_s3, %s1320_s16 }
  0x10   : > { %v334_v3 = vpack.c.bf16 %v326_v0, %v326_v0  ;;  %v336_v4 = vpack.c.bf16 %v328_v1, %v328_v1  ;;  %v337_v5 = vpack.c.bf16 %v329_v2, %v329_v2  ;;  %v302_v6 = vld [vmem:[%s1330_s22] sm:$0xff]  ;;  %v304_v7 = vld [vmem:[%s1330_s22 + $0x10] sm:$0xff]  ;;  %v305_v8 = vld [vmem:[%s1330_s22 + $0x18] sm:$0xff]  ;;  %280 = vst.msk [vmem:[#allocation2 + $0x18] sm:$0xff] %vm276_vm1, %v1279_v50 }
  0x11   : > { %v310_v9 = vmul.f32 0.35355338, %v302_v6  ;;  %v312_v10 = vmul.f32 0.35355338, %v304_v7  ;;  %v332_v14 = vld [vmem:[%s254_s19 + $0x30] sm:$0xff]  ;;  %v327_v15 = vld [vmem:[%s254_s19 + $0x8] sm:$0xff] }
  0x12   : > { %v363_v11 = vsel %vm293_vm0, %v334_v3, 0  ;;  %v401_v12 = vsel %vm293_vm0, %v336_v4, 0  ;;  %v420_v13 = vsel %vm293_vm0, %v337_v5, 0  ;;  %v333_v16 = vld [vmem:[%s254_s19 + $0x38] sm:$0xff]  ;;  %v313_v17 = vmul.f32 0.35355338, %v305_v8 }
  0x13   : > { %372 = vmatpush.bf16.xpose.msra.mxu0 %v363_v11  ;;  %410 = vmatpush.bf16.xpose.msra.mxu2 %v401_v12  ;;  %v303_v18 = vld [vmem:[%s1330_s22 + $0x8] sm:$0xff]  ;;  %v340_v19 = vpack.c.bf16 %v332_v14, %v332_v14  ;;  %v335_v20 = vpack.c.bf16 %v327_v15, %v327_v15  ;;  %v341_v21 = vpack.c.bf16 %v333_v16, %v333_v16  ;;  %v330_v23 = vld [vmem:[%s254_s19 + $0x20] sm:$0xff]  ;;  %v308_v36 = vld [vmem:[%s1330_s22 + $0x30] sm:$0xff] }
  0x14   : > { %429 = vmatpush.bf16.xpose.msra.mxu3 %v420_v13  ;;  %v331_v22 = vld [vmem:[%s254_s19 + $0x28] sm:$0xff]  ;;  %v318_v24 = vpack.c.bf16 %v310_v9, %v310_v9  ;;  %v320_v25 = vpack.c.bf16 %v312_v10, %v312_v10  ;;  %v338_v27 = vpack.c.bf16 %v330_v23, %v330_v23  ;;  %v311_v31 = vmul.f32 0.35355338, %v303_v18  ;;  %v306_v37 = vld [vmem:[%s1330_s22 + $0x20] sm:$0xff]  ;;  %v309_v38 = vld [vmem:[%s1330_s22 + $0x38] sm:$0xff]  ;;  %281 = vst.msk [vmem:[#allocation2 + $0x20] sm:$0xff] %vm276_vm1, %v1279_v50 }
  0x15   : > { %v339_v26 = vpack.c.bf16 %v331_v22, %v331_v22  ;;  %v477_v28 = vsel %vm293_vm0, %v340_v19, 0  ;;  %v382_v29 = vsel %vm293_vm0, %v335_v20, 0  ;;  %v496_v30 = vsel %vm293_vm0, %v341_v21, 0  ;;  %v307_v42 = vld [vmem:[%s1330_s22 + $0x28] sm:$0xff]  ;;  %282 = vst.msk [vmem:[#allocation2 + $0x28] sm:$0xff] %vm276_vm1, %v1279_v50  ;;  %v511_v11 = vld [vmem:[#allocation2] sm:$0xff] }
  0x16   : > { %v321_v32 = vpack.c.bf16 %v313_v17, %v313_v17  ;;  %391 = vmatpush.bf16.xpose.msra.mxu1 %v382_v29  ;;  %v439_v34 = vsel %vm293_vm0, %v338_v27, 0  ;;  %v319_v35 = vpack.c.bf16 %v311_v31, %v311_v31  ;;  %v316_v39 = vmul.f32 0.35355338, %v308_v36  ;;  %283 = vst.msk [vmem:[#allocation2 + $0x30] sm:$0xff] %vm276_vm1, %v1279_v50  ;;  %v513_v14 = vld [vmem:[#allocation2 + $0x10] sm:$0xff]  ;;  %v512_v16 = vld [vmem:[#allocation2 + $0x8] sm:$0xff] }
  0x17   : > { %v458_v33 = vsel %vm293_vm0, %v339_v26, 0  ;;  %v314_v40 = vmul.f32 0.35355338, %v306_v37  ;;  %v317_v41 = vmul.f32 0.35355338, %v309_v38  ;;  %284 = vst.msk [vmem:[#allocation2 + $0x38] sm:$0xff] %vm276_vm1, %v1279_v50 }
  0x18   : > { %v324_v43 = vpack.c.bf16 %v316_v39, %v316_v39  ;;  %v315_v45 = vmul.f32 0.35355338, %v307_v42  ;;  %v1280_v9 = vmov 0   ;;  %v1281_v10 = vmov 0.0   ;;  %v514_v21 = vld [vmem:[#allocation2 + $0x18] sm:$0xff] }
  0x19   : > { %v322_v44 = vpack.c.bf16 %v314_v40, %v314_v40  ;;  %v325_v46 = vpack.c.bf16 %v317_v41, %v317_v41  ;;  %1206 = vset.pattern.permute.xlu1 %v1280_v9  ;;  %1204 = vset.pattern.permute.xlu2 %v1280_v9  ;;  %295 = vst.msk [vmem:[#allocation4 + $0x8] sm:$0xff] %vm293_vm0, %v1281_v10 }
  0x1a   : > { %1155 = vmatmul.msk.bf16.vlgmr.msra.gmra.mxu0 %vm293_vm0, %v318_v24  ;;  %1157 = vmatmul.msk.bf16.vlgmr.msra.gmra.mxu2 %vm293_vm0, %v320_v25  ;;  %v323_v47 = vpack.c.bf16 %v315_v45, %v315_v45  ;;  %285 = vst.msk [vmem:[#allocation3] sm:$0xff] %vm276_vm1, %v1281_v10 }
  0x1b   : > { %486 = vmatpush.bf16.xpose.msrb.mxu2 %v477_v28  ;;  %448 = vmatpush.bf16.xpose.msrb.mxu0 %v439_v34  ;;  %286 = vst.msk [vmem:[#allocation3 + $0x8] sm:$0xff] %vm276_vm1, %v1281_v10  ;;  %v515_v27 = vld [vmem:[#allocation2 + $0x20] sm:$0xff] }
  0x1c   : > { %505 = vmatpush.bf16.xpose.msrb.mxu3 %v496_v30  ;;  %1205 = vset.pattern.permute.xlu0 %v1280_v9  ;;  %287 = vst.msk [vmem:[#allocation3 + $0x10] sm:$0xff] %vm276_vm1, %v1281_v10  ;;  %v516_v25 = vld [vmem:[#allocation2 + $0x28] sm:$0xff]  ;;  %v342_v9 = vld [vmem:[%s1454_s25] sm:$0xff] }
  0x1d   : > { %1158 = vmatmul.msk.bf16.vlgmr.msra.gmra.mxu3 %vm293_vm0, %v321_v32  ;;  %1156 = vmatmul.msk.bf16.vlgmr.msra.gmra.mxu1 %vm293_vm0, %v319_v35  ;;  %288 = vst.msk [vmem:[#allocation3 + $0x18] sm:$0xff] %vm276_vm1, %v1281_v10  ;;  %v517_v26 = vld [vmem:[#allocation2 + $0x30] sm:$0xff] }
  0x1e   : > { %467 = vmatpush.bf16.xpose.msrb.mxu1 %v458_v33  ;;  %289 = vst.msk [vmem:[#allocation3 + $0x20] sm:$0xff] %vm276_vm1, %v1281_v10  ;;  %v1422_v38 = vld [vmem:[#allocation2 + $0x38] sm:$0xff] }
  0x1f   : > { %290 = vst.msk [vmem:[#allocation3 + $0x28] sm:$0xff] %vm276_vm1, %v1281_v10 }
  0x20   : > { %291 = vst.msk [vmem:[#allocation3 + $0x30] sm:$0xff] %vm276_vm1, %v1281_v10 }
  0x21   : > { %292 = vst.msk [vmem:[#allocation3 + $0x38] sm:$0xff] %vm276_vm1, %v1281_v10 }
  0x22   : > { %294 = vst.msk [vmem:[#allocation4] sm:$0xff] %vm293_vm0, %v1281_v10 }
  0x23   : > { %296 = vst.msk [vmem:[#allocation4 + $0x10] sm:$0xff] %vm293_vm0, %v1281_v10 }
  0x24   : > { %297 = vst.msk [vmem:[#allocation4 + $0x18] sm:$0xff] %vm293_vm0, %v1281_v10 }
  0x25   : > { %298 = vst.msk [vmem:[#allocation4 + $0x20] sm:$0xff] %vm293_vm0, %v1281_v10 }
  0x26   : > { %299 = vst.msk [vmem:[#allocation4 + $0x28] sm:$0xff] %vm293_vm0, %v1281_v10 }
  0x27   : > { %300 = vst.msk [vmem:[#allocation4 + $0x30] sm:$0xff] %vm293_vm0, %v1281_v10 }
  0x28   : > { %301 = vst.msk [vmem:[#allocation4 + $0x38] sm:$0xff] %vm293_vm0, %v1281_v10 }
  0x2a   : > { %1161 = vmatmul.msk.bf16.vlgmr.msrb.gmra.mxu2 %vm293_vm0, %v324_v43  ;;  %1159 = vmatmul.msk.bf16.vlgmr.msrb.gmra.mxu0 %vm293_vm0, %v322_v44 }
  0x2d   : > { %1162 = vmatmul.msk.bf16.vlgmr.msrb.gmra.mxu3 %vm293_vm0, %v325_v46  ;;  %1160 = vmatmul.msk.bf16.vlgmr.msrb.gmra.mxu1 %vm293_vm0, %v323_v47 }
  0x97   : > { %v1356_v48 = vpop.f32.mrf.mxu0 }
  0x98   : > { %v519_v49 = vsel %vm293_vm0, %v1356_v48, -inf }
  0x99   : > { %520 = vmax.xlane.f32.xlu1 %v519_v49 }
  0x9a   : > { %v1363_v51 = vpop.f32.mrf.mxu1 }
  0x9b   : > { %v522_v55 = vsel %vm293_vm0, %v1363_v51, -inf }
  0x9d   : > { %v1367_v52 = vpop.f32.mrf.mxu2 }
  0x9e   : > { %v525_v54 = vsel %vm293_vm0, %v1367_v52, -inf }
  0x9f   : > { %526 = vmax.xlane.f32.xlu0 %v525_v54  ;;  %v376_v56 = vpop.f32.mrf.mxu0 }
  0xa0   : > { %v1370_v53 = vpop.f32.mrf.mxu3 }
  0xa1   : > { %523 = vmax.xlane.f32.xlu1 %v522_v55  ;;  %v528_v58 = vsel %vm293_vm0, %v1370_v53, -inf }
  0xa2   : > { %v395_v57 = vpop.f32.mrf.mxu1 }
  0xa5   : > { %v414_v59 = vpop.f32.mrf.mxu2 }
  0xa7   : > { %529 = vmax.xlane.f32.xlu0 %v528_v58  ;;  %v1380_v61 = vpop.f32.mrf.mxu0 }
  0xa8   : > { %v433_v60 = vpop.f32.mrf.mxu3  ;;  %v531_v63 = vsel %vm293_vm0, %v1380_v61, -inf }
  0xaa   : > { %v1382_v62 = vpop.f32.mrf.mxu1 }
  0xab   : > { %v534_v0 = vsel %vm293_vm0, %v1382_v62, -inf }
  0xac   : > { %535 = vmax.xlane.f32.xlu1 %v534_v0 }
  0xad   : > { %v1388_v1 = vpop.f32.mrf.mxu2 }
  0xae   : > { %v537_v3 = vsel %vm293_vm0, %v1388_v1, -inf }
  0xaf   : > { %538 = vmax.xlane.f32.xlu2 %v537_v3  ;;  %532 = vmax.xlane.f32.xlu0 %v531_v63  ;;  %v452_v4 = vpop.f32.mrf.mxu0  ;;  %v344_v63 = vld [vmem:[%s1454_s25 + $0x10] sm:$0xff] }
  0xb0   : > { %v1390_v2 = vpop.f32.mrf.mxu3  ;;  %v352_v0 = vpack.c.bf16 %v344_v63, %v344_v63  ;;  %v343_v4 = vld [vmem:[%s1454_s25 + $0x8] sm:$0xff] }
  0xb1   : > { %v540_v6 = vsel %vm293_vm0, %v1390_v2, -inf }
  0xb2   : > { %v471_v5 = vpop.f32.mrf.mxu1  ;;  %v803_v3 = vsel %vm763_vm2, %v352_v0, 0 }
  0xb3   : > { %812 = vmatpush.bf16.msra.mxu2 %v803_v3  ;;  %v351_v5 = vpack.c.bf16 %v343_v4, %v343_v4 }
  0xb5   : > { %v490_v7 = vpop.f32.mrf.mxu2 }
  0xb6   : > { %v348_v7 = vld [vmem:[%s1454_s25 + $0x30] sm:$0xff] }
  0xb7   : > { %541 = vmax.xlane.f32.xlu2 %v540_v6  ;;  %v784_v6 = vsel %vm763_vm2, %v351_v5, 0 }
  0xb8   : > { %v509_v8 = vpop.f32.mrf.mxu3  ;;  %793 = vmatpush.bf16.msra.mxu1 %v784_v6 }
  0xb9   : > { %v356_v8 = vpack.c.bf16 %v348_v7, %v348_v7 }
  0xbb   : > { %v879_v10 = vsel %vm763_vm2, %v356_v8, 0 }
  0xbc   : > { %888 = vmatpush.bf16.msrb.mxu2 %v879_v10 }
 0x10c   : > { %v521_v12 = vpop.xlane.xlu1 %520 }
 0x10d   : > { %v543_v13 = vmax.f32 %v511_v11, %v521_v12 }
 0x10f   : > { %929 = vst.msk [vmem:[#allocation2] sm:$0xff] %vm276_vm1, %v543_v13  ;;  %577 = vperm.xlu1 %1206, %v543_v13   ;;  %v551_v44 = vsub.f32 %v511_v11, %v543_v13  ;;  %v350_v11 = vpack.c.bf16 %v342_v9, %v342_v9 }
 0x111   : > { %v559_v47 = vmul.f32 1.442695, %v551_v44  ;;  %v765_v12 = vsel %vm763_vm2, %v350_v11, 0 }
 0x112   : > { %v527_v15 = vpop.xlane.xlu0 %526  ;;  %774 = vmatpush.bf16.msra.mxu0 %v765_v12 }
 0x113   : > { %v545_v17 = vmax.f32 %v513_v14, %v527_v15 }
 0x114   : > { %v524_v18 = vpop.xlane.xlu1 %523 }
 0x115   : > { %931 = vst.msk [vmem:[#allocation2 + $0x10] sm:$0xff] %vm276_vm1, %v545_v17  ;;  %587 = vperm.xlu2 %1204, %v545_v17   ;;  %v544_v19 = vmax.f32 %v512_v16, %v524_v18  ;;  %v553_v20 = vsub.f32 %v513_v14, %v545_v17  ;;  %v345_v17 = vld [vmem:[%s1454_s25 + $0x18] sm:$0xff] }
 0x117   : > { %930 = vst.msk [vmem:[#allocation2 + $0x8] sm:$0xff] %vm276_vm1, %v544_v19  ;;  %v563_v22 = vmul.f32 1.442695, %v553_v20  ;;  %v552_v36 = vsub.f32 %v512_v16, %v544_v19  ;;  %v346_v20 = vld [vmem:[%s1454_s25 + $0x20] sm:$0xff] }
 0x119   : > { %1207 = vpow2.f32 %v563_v22  ;;  %v561_v39 = vmul.f32 1.442695, %v552_v36 }
 0x11a   : > { %v530_v23 = vpop.xlane.xlu0 %529 }
 0x11b   : > { %v546_v24 = vmax.f32 %v514_v21, %v530_v23 }
 0x11d   : > { %932 = vst.msk [vmem:[#allocation2 + $0x18] sm:$0xff] %vm276_vm1, %v546_v24  ;;  %582 = vperm.xlu2 %1204, %v544_v19   ;;  %592 = vperm.xlu0 %1205, %v546_v24   ;;  %v554_v50 = vsub.f32 %v514_v21, %v546_v24  ;;  %v353_v19 = vpack.c.bf16 %v345_v17, %v345_v17 }
 0x11e   : > { %v354_v24 = vpack.c.bf16 %v346_v20, %v346_v20 }
 0x11f   : > { %v536_v28 = vpop.xlane.xlu1 %535  ;;  %v1417_v34 = vpop.eup %1207  ;;  %v565_v55 = vmul.f32 1.442695, %v554_v50  ;;  %v822_v23 = vsel %vm763_vm2, %v353_v19, 0 }
 0x120   : > { %v548_v29 = vmax.f32 %v516_v25, %v536_v28  ;;  %831 = vmatpush.bf16.msra.mxu3 %v822_v23 }
 0x122   : > { %v539_v30 = vpop.xlane.xlu2 %538  ;;  %v533_v31 = vpop.xlane.xlu0 %532  ;;  %934 = vst.msk [vmem:[#allocation2 + $0x28] sm:$0xff] %vm276_vm1, %v548_v29  ;;  %v556_v42 = vsub.f32 %v516_v25, %v548_v29 }
 0x123   : > { %v549_v32 = vmax.f32 %v517_v26, %v539_v30  ;;  %v547_v33 = vmax.f32 %v515_v27, %v533_v31 }
 0x124   : > { %v569_v46 = vmul.f32 1.442695, %v556_v42 }
 0x125   : > { %935 = vst.msk [vmem:[#allocation2 + $0x30] sm:$0xff] %vm276_vm1, %v549_v32  ;;  %607 = vperm.xlu2 %1204, %v549_v32   ;;  %716 = vperm.xlu0 %1205, %v1417_v34   ;;  %v555_v35 = vsub.f32 %v515_v27, %v547_v33  ;;  %v557_v57 = vsub.f32 %v517_v26, %v549_v32 }
 0x126   : > { %933 = vst.msk [vmem:[#allocation2 + $0x20] sm:$0xff] %vm276_vm1, %v547_v33 }
 0x127   : > { %v567_v37 = vmul.f32 1.442695, %v555_v35  ;;  %v571_v58 = vmul.f32 1.442695, %v557_v57  ;;  %v347_v57 = vld [vmem:[%s1454_s25 + $0x28] sm:$0xff] }
 0x129   : > { %1209 = vpow2.f32 %v567_v37  ;;  %v349_v37 = vld [vmem:[%s1454_s25 + $0x38] sm:$0xff] }
 0x12a   : > { %v542_v40 = vpop.xlane.xlu2 %541  ;;  %1211 = vpow2.f32 %v561_v39 }
 0x12b   : > { %v1425_v41 = vmax.f32 %v1422_v38, %v542_v40  ;;  %1213 = vpow2.f32 %v569_v46 }
 0x12c   : > { %1215 = vpow2.f32 %v559_v47 }
 0x12d   : > { %v558_v43 = vsub.f32 %v1422_v38, %v1425_v41  ;;  %936 = vst.msk [vmem:[#allocation2 + $0x38] sm:$0xff] %vm276_vm1, %v1425_v41  ;;  %612 = vperm.xlu1 %1206, %v1425_v41   ;;  %597 = vperm.xlu2 %1204, %v547_v33   ;;  %1217 = vpow2.f32 %v565_v55 }
 0x12e   : > { %1219 = vpow2.f32 %v571_v58  ;;  %v355_v58 = vpack.c.bf16 %v347_v57, %v347_v57 }
 0x12f   : > { %v1432_v45 = vpop.eup %1209  ;;  %v573_v20 = vmul.f32 1.442695, %v558_v43  ;;  %v640_v43 = vld [vmem:[#allocation3 + $0x8] sm:$0xff] }
 0x130   : > { %726 = vperm.xlu0 %1205, %v1432_v45   ;;  %v1435_v49 = vpop.eup %1211  ;;  %v860_v3 = vsel %vm763_vm2, %v355_v58, 0 }
 0x131   : > { %v1438_v54 = vpop.eup %1213  ;;  %869 = vmatpush.bf16.msrb.mxu1 %v860_v3  ;;  %v642_v3 = vld [vmem:[#allocation3 + $0x18] sm:$0xff] }
 0x132   : > { %v1440_v56 = vpop.eup %1215 }
 0x133   : > { %v1444_v59 = vpop.eup %1217 }
 0x134   : > { %v1447_v60 = vpop.eup %1219 }
 0x135   : > { %602 = vperm.xlu1 %1206, %v548_v29   ;;  %711 = vperm.xlu2 %1204, %v1435_v49  }
 0x13d   : > { %706 = vperm.xlu1 %1206, %v1440_v56   ;;  %731 = vperm.xlu2 %1204, %v1438_v54  }
 0x145   : > { %721 = vperm.xlu1 %1206, %v1444_v59  }
 0x14d   : > { %736 = vperm.xlu1 %1206, %v1447_v60  }
 0x16f   : > { %v588_v13 = vpop.permute.xlu2 %587 }
 0x170   : > { %v617_v14 = vsub.f32 %v1367_v52, %v588_v13  ;;  %v841_v52 = vsel %vm763_vm2, %v354_v24, 0 }
 0x171   : > { %850 = vmatpush.bf16.msrb.mxu0 %v841_v52 }
 0x172   : > { %v627_v15 = vmul.f32 1.442695, %v617_v14 }
 0x174   : > { %1221 = vpow2.f32 %v627_v15 }
 0x177   : > { %v583_v16 = vpop.permute.xlu2 %582 }
 0x178   : > { %v616_v18 = vsub.f32 %v1363_v51, %v583_v16 }
 0x17a   : > { %v1222_v21 = vpop.eup %1221  ;;  %v625_v22 = vmul.f32 1.442695, %v616_v18 }
 0x17b   : > { %v754_v25 = vpack.c.bf16 %v1222_v21, %v1222_v21  ;;  %v661_v26 = vsel %vm293_vm0, %v1222_v21, 0.0 }
 0x17c   : > { %1223 = vpow2.f32 %v625_v22  ;;  %662 = vadd.xlane.f32.xlu1 %v661_v26 }
 0x17d   : > { %1165 = vmatmul.msk.bf16.vlgmr.msra.gmra.mxu2 %vm293_vm0, %v754_v25  ;;  %v641_v25 = vld [vmem:[#allocation3 + $0x10] sm:$0xff] }
 0x17e   : > { %v649_v26 = vmul.f32 %v1417_v34, %v641_v25  ;;  %v639_v34 = vld [vmem:[#allocation3] sm:$0xff] }
 0x17f   : > { %v608_v51 = vpop.permute.xlu2 %607 }
 0x180   : > { %v621_v27 = vsub.f32 %v1388_v1, %v608_v51  ;;  %v357_v1 = vpack.c.bf16 %v349_v37, %v349_v37 }
 0x181   : > { %v578_v28 = vpop.permute.xlu1 %577 }
 0x182   : > { %v1224_v29 = vpop.eup %1223  ;;  %v635_v30 = vmul.f32 1.442695, %v621_v27  ;;  %v615_v31 = vsub.f32 %v1356_v48, %v578_v28  ;;  %v898_v44 = vsel %vm763_vm2, %v357_v1, 0  ;;  %v648_v27 = vmul.f32 %v1435_v49, %v640_v43 }
 0x183   : > { %v753_v32 = vpack.c.bf16 %v1224_v29, %v1224_v29  ;;  %v658_v33 = vsel %vm293_vm0, %v1224_v29, 0.0  ;;  %907 = vmatpush.bf16.msrb.mxu3 %v898_v44 }
 0x184   : > { %1225 = vpow2.f32 %v635_v30  ;;  %v623_v35 = vmul.f32 1.442695, %v615_v31  ;;  %659 = vadd.xlane.f32.xlu2 %v658_v33  ;;  %v697_v33 = vld [vmem:[#allocation4 + $0x8] sm:$0xff] }
 0x185   : > { %1164 = vmatmul.msk.bf16.vlgmr.msra.gmra.mxu1 %vm293_vm0, %v753_v32  ;;  %v698_v32 = vld [vmem:[#allocation4 + $0x10] sm:$0xff] }
 0x186   : > { %1227 = vpow2.f32 %v623_v35 }
 0x187   : > { %v598_v36 = vpop.permute.xlu2 %597 }
 0x188   : > { %v619_v39 = vsub.f32 %v1380_v61, %v598_v36 }
 0x18a   : > { %v1226_v40 = vpop.eup %1225  ;;  %v631_v42 = vmul.f32 1.442695, %v619_v39  ;;  %v647_v39 = vmul.f32 %v1440_v56, %v639_v34 }
 0x18b   : > { %v758_v48 = vpack.c.bf16 %v1226_v40, %v1226_v40  ;;  %v673_v11 = vsel %vm293_vm0, %v1226_v40, 0.0 }
 0x18c   : > { %v1228_v46 = vpop.eup %1227  ;;  %1229 = vpow2.f32 %v631_v42 }
 0x18d   : > { %v752_v47 = vpack.c.bf16 %v1228_v46, %v1228_v46  ;;  %1169 = vmatmul.msk.bf16.vlgmr.msrb.gmra.mxu2 %vm293_vm0, %v758_v48  ;;  %v655_v50 = vsel %vm293_vm0, %v1228_v46, 0.0 }
 0x18e   : > { %656 = vadd.xlane.f32.xlu0 %v655_v50 }
 0x18f   : > { %1163 = vmatmul.msk.bf16.vlgmr.msra.gmra.mxu0 %vm293_vm0, %v752_v47  ;;  %v593_v55 = vpop.permute.xlu0 %592  ;;  %v712_v23 = vpop.permute.xlu2 %711  ;;  %v643_v47 = vld [vmem:[#allocation3 + $0x20] sm:$0xff] }
 0x190   : > { %v618_v61 = vsub.f32 %v1370_v53, %v593_v55  ;;  %v745_v1 = vmul.f32 %v712_v23, %v697_v33  ;;  %v696_v55 = vld [vmem:[#allocation4] sm:$0xff]  ;;  %v651_v56 = vmul.f32 %v1432_v45, %v643_v47  ;;  %v646_v23 = vld [vmem:[#allocation3 + $0x38] sm:$0xff] }
 0x192   : > { %v1230_v63 = vpop.eup %1229  ;;  %v629_v0 = vmul.f32 1.442695, %v618_v61 }
 0x193   : > { %v667_v4 = vsel %vm293_vm0, %v1230_v63, 0.0  ;;  %v756_v8 = vpack.c.bf16 %v1230_v63, %v1230_v63 }
 0x194   : > { %1231 = vpow2.f32 %v629_v0 }
 0x196   : > { %668 = vadd.xlane.f32.xlu0 %v667_v4 }
 0x197   : > { %v1505_v52 = vpop.permute.xlu2 %731  ;;  %v717_v41 = vpop.permute.xlu0 %716 }
 0x198   : > { %v746_v35 = vmul.f32 %v717_v41, %v698_v32 }
 0x19a   : > { %v1232_v5 = vpop.eup %1231 }
 0x19b   : > { %v755_v6 = vpack.c.bf16 %v1232_v5, %v1232_v5  ;;  %v664_v7 = vsel %vm293_vm0, %v1232_v5, 0.0  ;;  %v702_v5 = vld [vmem:[#allocation4 + $0x30] sm:$0xff] }
 0x19c   : > { %665 = vadd.xlane.f32.xlu2 %v664_v7 }
 0x19d   : > { %1166 = vmatmul.msk.bf16.vlgmr.msra.gmra.mxu3 %vm293_vm0, %v755_v6 }
 0x19f   : > { %v613_v9 = vpop.permute.xlu1 %612  ;;  %1167 = vmatmul.msk.bf16.vlgmr.msrb.gmra.mxu0 %vm293_vm0, %v756_v8  ;;  %v650_v8 = vmul.f32 %v1444_v59, %v642_v3 }
 0x1a0   : > { %v622_v53 = vsub.f32 %v1390_v2, %v613_v9 }
 0x1a2   : > { %v637_v10 = vmul.f32 1.442695, %v622_v53  ;;  %v1509_v30 = vpop.permute.xlu0 %726 }
 0x1a4   : > { %1233 = vpow2.f32 %v637_v10  ;;  %674 = vadd.xlane.f32.xlu2 %v673_v11 }
 0x1a7   : > { %v603_v12 = vpop.permute.xlu1 %602 }
 0x1a8   : > { %v620_v13 = vsub.f32 %v1382_v62, %v603_v12 }
 0x1aa   : > { %v1234_v14 = vpop.eup %1233  ;;  %v633_v15 = vmul.f32 1.442695, %v620_v13  ;;  %v645_v13 = vld [vmem:[#allocation3 + $0x30] sm:$0xff] }
 0x1ab   : > { %v759_v16 = vpack.c.bf16 %v1234_v14, %v1234_v14  ;;  %v676_v17 = vsel %vm293_vm0, %v1234_v14, 0.0 }
 0x1ac   : > { %1235 = vpow2.f32 %v633_v15  ;;  %677 = vadd.xlane.f32.xlu0 %v676_v17  ;;  %v700_v17 = vld [vmem:[#allocation4 + $0x20] sm:$0xff] }
 0x1ad   : > { %1170 = vmatmul.msk.bf16.vlgmr.msrb.gmra.mxu3 %vm293_vm0, %v759_v16  ;;  %1237 = vpow2.f32 %v573_v20  ;;  %v653_v16 = vmul.f32 %v1447_v60, %v645_v13 }
 0x1af   : > { %v707_v21 = vpop.permute.xlu1 %706 }
 0x1b0   : > { %v744_v0 = vmul.f32 %v707_v21, %v696_v55  ;;  %v748_v21 = vmul.f32 %v1509_v30, %v700_v17  ;;  %v644_v30 = vld [vmem:[#allocation3 + $0x28] sm:$0xff] }
 0x1b2   : > { %v1236_v18 = vpop.eup %1235 }
 0x1b3   : > { %v757_v19 = vpack.c.bf16 %v1236_v18, %v1236_v18  ;;  %v670_v2 = vsel %vm293_vm0, %v1236_v18, 0.0  ;;  %v1499_v62 = vpop.eup %1237 }
 0x1b4   : > { %671 = vadd.xlane.f32.xlu1 %v670_v2 }
 0x1b5   : > { %1168 = vmatmul.msk.bf16.vlgmr.msrb.gmra.mxu1 %vm293_vm0, %v757_v19 }
 0x1b7   : > { %v1502_v22 = vpop.permute.xlu1 %721 }
 0x1bf   : > { %v737_v24 = vpop.permute.xlu1 %736 }
 0x1c0   : > { %741 = vperm.xlu0 %1205, %v1499_v62   ;;  %v750_v9 = vmul.f32 %v737_v24, %v702_v5  ;;  %v699_v24 = vld [vmem:[#allocation4 + $0x18] sm:$0xff] }
 0x1c1   : > { %v747_v60 = vmul.f32 %v1502_v22, %v699_v24 }
 0x1ef   : > { %v663_v51 = vpop.xlane.xlu1 %662 }
 0x1f0   : > { %v681_v38 = vadd.f32 %v663_v51, %v649_v26  ;;  %v654_v51 = vmul.f32 %v1499_v62, %v646_v23  ;;  %v652_v62 = vmul.f32 %v1438_v54, %v644_v30 }
 0x1f2   : > { %690 = vst.msk [vmem:[#allocation3 + $0x10] sm:$0xff] %vm276_vm1, %v681_v38 }
 0x1f7   : > { %v660_v28 = vpop.xlane.xlu2 %659 }
 0x1f8   : > { %v680_v29 = vadd.f32 %v660_v28, %v648_v27 }
 0x1f9   : > { %v942_v31 = vld [vmem:[#allocation3 + $0x10] sm:$0xff] }
 0x1fa   : > { %689 = vst.msk [vmem:[#allocation3 + $0x8] sm:$0xff] %vm276_vm1, %v680_v29  ;;  %1239 = vrcp.f32 %v942_v31 }
 0x200   : > { %v1240_v36 = vpop.eup %1239  ;;  %v814_v37 = vpop.f32.mrf.mxu2 }
 0x201   : > { %v915_v40 = vadd.f32 %v814_v37, %v746_v35  ;;  %976 = vperm.xlu0 %1205, %v1240_v36   ;;  %v657_v49 = vpop.xlane.xlu0 %656  ;;  %v941_v42 = vld [vmem:[#allocation3 + $0x8] sm:$0xff] }
 0x202   : > { %v679_v44 = vadd.f32 %v657_v49, %v647_v39  ;;  %v795_v48 = vpop.f32.mrf.mxu1  ;;  %1241 = vrcp.f32 %v941_v42  ;;  %v701_v36 = vld [vmem:[#allocation4 + $0x28] sm:$0xff] }
 0x203   : > { %923 = vst.msk [vmem:[#allocation4 + $0x10] sm:$0xff] %vm293_vm0, %v915_v40  ;;  %v914_v46 = vadd.f32 %v795_v48, %v745_v1  ;;  %v703_v1 = vld [vmem:[#allocation4 + $0x38] sm:$0xff]  ;;  %v749_v40 = vmul.f32 %v1505_v52, %v701_v36 }
 0x204   : > { %688 = vst.msk [vmem:[#allocation3] sm:$0xff] %vm276_vm1, %v679_v44 }
 0x205   : > { %922 = vst.msk [vmem:[#allocation4 + $0x8] sm:$0xff] %vm293_vm0, %v914_v46 }
 0x208   : > { %v1242_v50 = vpop.eup %1241  ;;  %v816_v57 = vpop.f32.mrf.mxu2 }
 0x209   : > { %971 = vperm.xlu1 %1206, %v1242_v50   ;;  %v669_v61 = vpop.xlane.xlu0 %668 }
 0x20a   : > { %v683_v58 = vadd.f32 %v669_v61, %v651_v56  ;;  %v797_v63 = vpop.f32.mrf.mxu1  ;;  %v958_v61 = vld [vmem:[#allocation4 + $0x10] sm:$0xff] }
 0x20b   : > { %v940_v4 = vld [vmem:[#allocation3] sm:$0xff] }
 0x20c   : > { %692 = vst.msk [vmem:[#allocation3 + $0x20] sm:$0xff] %vm276_vm1, %v683_v58  ;;  %v776_v6 = vpop.f32.mrf.mxu0  ;;  %1243 = vrcp.f32 %v940_v4 }
 0x20d   : > { %v913_v7 = vadd.f32 %v776_v6, %v744_v0  ;;  %v957_v0 = vld [vmem:[#allocation4 + $0x8] sm:$0xff] }
 0x20f   : > { %921 = vst.msk [vmem:[#allocation4] sm:$0xff] %vm293_vm0, %v913_v7  ;;  %v666_v53 = vpop.xlane.xlu2 %665 }
 0x210   : > { %v682_v45 = vadd.f32 %v666_v53, %v650_v8  ;;  %v890_v10 = vpop.f32.mrf.mxu2 }
 0x211   : > { %v919_v11 = vadd.f32 %v890_v10, %v750_v9 }
 0x212   : > { %v1244_v12 = vpop.eup %1243  ;;  %691 = vst.msk [vmem:[#allocation3 + $0x18] sm:$0xff] %vm276_vm1, %v682_v45 }
 0x213   : > { %927 = vst.msk [vmem:[#allocation4 + $0x30] sm:$0xff] %vm293_vm0, %v919_v11  ;;  %966 = vperm.xlu2 %1204, %v1244_v12   ;;  %v944_v14 = vld [vmem:[#allocation3 + $0x20] sm:$0xff] }
 0x214   : > { %v778_v15 = vpop.f32.mrf.mxu0  ;;  %1245 = vrcp.f32 %v944_v14 }
 0x216   : > { %v956_v57 = vld [vmem:[#allocation4] sm:$0xff] }
 0x217   : > { %v675_v59 = vpop.xlane.xlu2 %674 }
 0x218   : > { %v685_v18 = vadd.f32 %v675_v59, %v653_v16  ;;  %v892_v19 = vpop.f32.mrf.mxu2 }
 0x219   : > { %v943_v2 = vld [vmem:[#allocation3 + $0x18] sm:$0xff] }
 0x21a   : > { %v1246_v20 = vpop.eup %1245  ;;  %694 = vst.msk [vmem:[#allocation3 + $0x30] sm:$0xff] %vm276_vm1, %v685_v18  ;;  %1247 = vrcp.f32 %v943_v2  ;;  %v962_v8 = vld [vmem:[#allocation4 + $0x30] sm:$0xff] }
 0x21b   : > { %986 = vperm.xlu1 %1206, %v1246_v20  }
 0x21c   : > { %v852_v25 = vpop.f32.mrf.mxu0 }
 0x21d   : > { %v917_v26 = vadd.f32 %v852_v25, %v748_v21 }
 0x21f   : > { %925 = vst.msk [vmem:[#allocation4 + $0x20] sm:$0xff] %vm293_vm0, %v917_v26  ;;  %v678_v38 = vpop.xlane.xlu0 %677 }
 0x220   : > { %v1248_v41 = vpop.eup %1247  ;;  %v686_v43 = vadd.f32 %v678_v38, %v654_v51  ;;  %v833_v27 = vpop.f32.mrf.mxu3 }
 0x221   : > { %v916_v28 = vadd.f32 %v833_v27, %v747_v60  ;;  %981 = vperm.xlu2 %1204, %v1248_v41   ;;  %v946_v29 = vld [vmem:[#allocation3 + $0x30] sm:$0xff] }
 0x222   : > { %695 = vst.msk [vmem:[#allocation3 + $0x38] sm:$0xff] %vm276_vm1, %v686_v43  ;;  %1249 = vrcp.f32 %v946_v29 }
 0x223   : > { %924 = vst.msk [vmem:[#allocation4 + $0x18] sm:$0xff] %vm293_vm0, %v916_v28 }
 0x224   : > { %v854_v31 = vpop.f32.mrf.mxu0 }
 0x226   : > { %v960_v10 = vld [vmem:[#allocation4 + $0x20] sm:$0xff] }
 0x227   : > { %v672_v32 = vpop.xlane.xlu1 %671 }
 0x228   : > { %v1250_v22 = vpop.eup %1249  ;;  %v684_v34 = vadd.f32 %v672_v32, %v652_v62  ;;  %v835_v33 = vpop.f32.mrf.mxu3 }
 0x229   : > { %996 = vperm.xlu2 %1204, %v1250_v22   ;;  %v947_v35 = vld [vmem:[#allocation3 + $0x38] sm:$0xff] }
 0x22a   : > { %693 = vst.msk [vmem:[#allocation3 + $0x28] sm:$0xff] %vm276_vm1, %v684_v34  ;;  %1251 = vrcp.f32 %v947_v35  ;;  %v959_v4 = vld [vmem:[#allocation4 + $0x18] sm:$0xff] }
 0x230   : > { %v1252_v37 = vpop.eup %1251  ;;  %v909_v39 = vpop.f32.mrf.mxu3 }
 0x231   : > { %1001 = vperm.xlu1 %1206, %v1252_v37   ;;  %v945_v49 = vld [vmem:[#allocation3 + $0x28] sm:$0xff] }
 0x232   : > { %v871_v42 = vpop.f32.mrf.mxu1  ;;  %v742_v54 = vpop.permute.xlu0 %741  ;;  %1253 = vrcp.f32 %v945_v49 }
 0x233   : > { %v918_v44 = vadd.f32 %v871_v42, %v749_v40  ;;  %v751_v48 = vmul.f32 %v742_v54, %v703_v1 }
 0x235   : > { %926 = vst.msk [vmem:[#allocation4 + $0x28] sm:$0xff] %vm293_vm0, %v918_v44  ;;  %v920_v46 = vadd.f32 %v909_v39, %v751_v48 }
 0x237   : > { %928 = vst.msk [vmem:[#allocation4 + $0x38] sm:$0xff] %vm293_vm0, %v920_v46 }
 0x238   : > { %v1254_v47 = vpop.eup %1253  ;;  %v911_v50 = vpop.f32.mrf.mxu3 }
 0x239   : > { %991 = vperm.xlu0 %1205, %v1254_v47  }
 0x23a   : > { %v873_v55 = vpop.f32.mrf.mxu1 }
 0x23c   : > { %v961_v15 = vld [vmem:[#allocation4 + $0x28] sm:$0xff] }
 0x23e   : > { %v963_v13 = vld [vmem:[#allocation4 + $0x38] sm:$0xff] }
 0x26d   : > { %v967_v52 = vpop.permute.xlu2 %966 }
 0x26e   : > { %v1004_v56 = vmul.f32 %v967_v52, %v956_v57 }
 0x270   : > { %1012 = vst.msk [vmem:[%s1539_s28] sm:$0xff] %vm293_vm0, %v1004_v56 }
 0x273   : > { %v977_v58 = vpop.permute.xlu0 %976 }
 0x274   : > { %v1006_v63 = vmul.f32 %v977_v58, %v958_v61 }
 0x276   : > { %1014 = vst.msk [vmem:[%s1539_s28 + $0x10] sm:$0xff] %vm293_vm0, %v1006_v63 }
 0x27b   : > { %v972_v3 = vpop.permute.xlu1 %971  ;;  %v982_v5 = vpop.permute.xlu2 %981 }
 0x27c   : > { %v1005_v6 = vmul.f32 %v972_v3, %v957_v0  ;;  %v1007_v7 = vmul.f32 %v982_v5, %v959_v4 }
 0x27e   : > { %1013 = vst.msk [vmem:[%s1539_s28 + $0x8] sm:$0xff] %vm293_vm0, %v1005_v6 }
 0x27f   : > { %1015 = vst.msk [vmem:[%s1539_s28 + $0x18] sm:$0xff] %vm293_vm0, %v1007_v7 }
 0x283   : > { %v997_v9 = vpop.permute.xlu2 %996 }
 0x284   : > { %v1010_v53 = vmul.f32 %v997_v9, %v962_v8 }
 0x286   : > { %1018 = vst.msk [vmem:[%s1539_s28 + $0x30] sm:$0xff] %vm293_vm0, %v1010_v53 }
 0x28d   : > { %v987_v45 = vpop.permute.xlu1 %986 }
 0x28e   : > { %v1008_v11 = vmul.f32 %v987_v45, %v960_v10 }
 0x290   : > { %1016 = vst.msk [vmem:[%s1539_s28 + $0x20] sm:$0xff] %vm293_vm0, %v1008_v11 }
 0x2a3   : > { %v1002_v12 = vpop.permute.xlu1 %1001 }
 0x2a4   : > { %v1011_v14 = vmul.f32 %v1002_v12, %v963_v13 }
 0x2a6   : > { %1019 = vst.msk [vmem:[%s1539_s28 + $0x38] sm:$0xff] %vm293_vm0, %v1011_v14 }
 0x2ab   : > { %v992_v16 = vpop.permute.xlu0 %991 }
 0x2ac   : > { %v1009_v59 = vmul.f32 %v992_v16, %v961_v15 }
 0x2ae   : > { %1017 = vst.msk [vmem:[%s1539_s28 + $0x28] sm:$0xff] %vm293_vm0, %v1009_v59 }
 0x2af PF: > { %s13_s14 = sadd.s32 1, %s1277_s14   ;;  %s1570_s12 = smov %s1273_s13 }
 0x2b0   : > { %p10_p5 = scmp.ge.s32.totalorder %s13_s14, 4   ;;  %s1571_s13 = smov %s1573_s15 }
 0x2b2   :  { %12 = sbr.rel (!%p10_p5) target bundleno = 2 (0x2), region = 76 }

</bundles_post_ra>
